<compile_context>
chip_gen: v7x
topology: tpu7x:2x2x1
jax: 0.10.0
libtpu: 0.0.40
codegen_flags: <defaults>
</compile_context>

<pallas_src>
import functools

import jax
import jax.numpy as jnp
from jax import lax
from jax.experimental import pallas as pl
from jax.experimental.pallas import tpu as pltpu


def _cdiv(a, b):
    return -(-a // b)


def _round_up(x, m):
    return ((x + m - 1) // m) * m


def _tile(dim, max_tile, align):
    """Balanced tiling: pick the tile COUNT first, then size the tile."""
    nt = _cdiv(dim, max_tile)
    tile = _round_up(_cdiv(dim, nt), align)
    return tile, _cdiv(dim, tile)


def _vmem_limit(block_bytes, acc_bytes=0):
    """VMEM budget from actual tile bytes (double-buffered) + ~50% headroom."""
    est = 2 * block_bytes + acc_bytes
    est = est + est // 2
    return int(min(max(est, 16 * 1024 * 1024), 48 * 1024 * 1024))


# ---------------------------------------------------------------------------
# Kernels — flattened (row-major) path: out = x(M,K) @ w(K,N) + b
# ---------------------------------------------------------------------------
def _flat_nok_kernel(x_ref, w_ref, b_ref, o_ref, *, cast_dtype):
    """Whole-K tile: single MXU dot, no accumulator."""
    x = x_ref[...]
    w = w_ref[...]
    if cast_dtype is not None:            # in-kernel cast (VPU, hidden under MXU)
        x = x.astype(cast_dtype)
        w = w.astype(cast_dtype)
    acc = jnp.dot(x, w, preferred_element_type=jnp.float32)
    o_ref[...] = (acc + b_ref[...].astype(jnp.float32)).astype(o_ref.dtype)


def _flat_k_kernel(x_ref, w_ref, b_ref, o_ref, acc_ref, *, cast_dtype):
    """K-split tile: f32 VMEM accumulator resident across the K grid axis."""
    k = pl.program_id(2)

    @pl.when(k == 0)
    def _():
        acc_ref[...] = jnp.zeros_like(acc_ref)

    x = x_ref[...]
    w = w_ref[...]
    if cast_dtype is not None:
        x = x.astype(cast_dtype)
        w = w.astype(cast_dtype)
    acc_ref[...] += jnp.dot(x, w, preferred_element_type=jnp.float32)

    @pl.when(k == pl.num_programs(2) - 1)
    def _():
        o_ref[...] = (acc_ref[...] + b_ref[...].astype(jnp.float32)
                      ).astype(o_ref.dtype)


# ---------------------------------------------------------------------------
# Kernels — channels-first path: out[b,n,t] = sum_k w[n,k] * x[b,k,t] + b[n]
# ---------------------------------------------------------------------------
def _cf_nok_kernel(x_ref, w_ref, b_ref, o_ref, *, cast_dtype):
    x = x_ref[0]                          # (TK, TT)
    w = w_ref[...]                        # (TN, TK)
    if cast_dtype is not None:
        x = x.astype(cast_dtype)
        w = w.astype(cast_dtype)
    acc = lax.dot_general(w, x, (((1,), (0,)), ((), ())),
                          preferred_element_type=jnp.float32)
    o_ref[0] = (acc + b_ref[...].astype(jnp.float32)).astype(o_ref.dtype)


def _cf_k_kernel(x_ref, w_ref, b_ref, o_ref, acc_ref, *, cast_dtype):
    k = pl.program_id(3)

    @pl.when(k == 0)
    def _():
        acc_ref[...] = jnp.zeros_like(acc_ref)

    x = x_ref[0]
    w = w_ref[...]
    if cast_dtype is not None:
        x = x.astype(cast_dtype)
        w = w.astype(cast_dtype)
    acc_ref[...] += lax.dot_general(w, x, (((1,), (0,)), ((), ())),
                                    preferred_element_type=jnp.float32)

    @pl.when(k == pl.num_programs(3) - 1)
    def _():
        o_ref[0] = (acc_ref[...] + b_ref[...].astype(jnp.float32)
                    ).astype(o_ref.dtype)


# ---------------------------------------------------------------------------
# Wrappers
# ---------------------------------------------------------------------------
def _linear_flat(x2d, weight, bias, *, use_bf16=False, tk_max=None):
    """x2d (M, K) @ weight(N, K).T + bias (N,) -> (M, N)."""
    M, K = x2d.shape
    N = weight.shape[0]
    out_dtype = x2d.dtype
    isz = jnp.dtype(x2d.dtype).itemsize
    sub_align = {4: 8, 2: 16, 1: 32}.get(isz, 8)
    if tk_max is None:
        tk_max = 2048 if isz <= 2 else 1024

    TM, grid_m = _tile(M, 512, sub_align)
    TN, grid_n = _tile(N, 512, 128)          # lane-dense output stores
    if grid_m * grid_n == 1 and TM >= 2 * sub_align:
        # v7x: make sure at least one "parallel" axis has extent >= 2.
        TM = _round_up(_cdiv(M, 2), sub_align)
        grid_m = _cdiv(M, TM)

    w_t = weight.T                           # (K, N): natural A(M,K)@B(K,N)
    b_row = bias.reshape(1, N)
    cast_dtype = jnp.bfloat16 if use_bf16 else None
    nt_k = _cdiv(K, tk_max)

    if nt_k == 1:
        # Whole-K strip: no K grid axis, no accumulator, no padding at all.
        TK = K
        blk_bytes = (TM * TK + TK * TN + TN + TM * TN) * isz
        return pl.pallas_call(
            functools.partial(_flat_nok_kernel, cast_dtype=cast_dtype),
            out_shape=jax.ShapeDtypeStruct((M, N), out_dtype),
            grid_spec=pltpu.PrefetchScalarGridSpec(
                num_scalar_prefetch=0,
                grid=(grid_m, grid_n),
                in_specs=[
                    pl.BlockSpec((TM, TK), lambda i, j: (i, 0)),
                    pl.BlockSpec((TK, TN), lambda i, j: (0, j)),
                    pl.BlockSpec((1, TN), lambda i, j: (0, j)),
                ],
                out_specs=pl.BlockSpec((TM, TN), lambda i, j: (i, j)),
            ),
            compiler_params=pltpu.CompilerParams(
                dimension_semantics=("parallel", "parallel"),
                vmem_limit_bytes=_vmem_limit(blk_bytes)),
        )(x2d, w_t, b_row)

    # K-split path: f32 accumulator across the innermost ("arbitrary") K axis.
    TK = _round_up(_cdiv(K, nt_k), 128)
    grid_k = _cdiv(K, TK)
    Kp = grid_k * TK
    if Kp != K:                              # only the K overhang must be zero
        x2d = jnp.pad(x2d, ((0, 0), (0, Kp - K)))
        w_t = jnp.pad(w_t, ((0, Kp - K), (0, 0)))
    blk_bytes = (TM * TK + TK * TN + TN + TM * TN) * isz
    acc_bytes = TM * TN * 4
    return pl.pallas_call(
        functools.partial(_flat_k_kernel, cast_dtype=cast_dtype),
        out_shape=jax.ShapeDtypeStruct((M, N), out_dtype),
        grid_spec=pltpu.PrefetchScalarGridSpec(
            num_scalar_prefetch=0,
            grid=(grid_m, grid_n, grid_k),
            in_specs=[
                pl.BlockSpec((TM, TK), lambda i, j, k: (i, k)),
                pl.BlockSpec((TK, TN), lambda i, j, k: (k, j)),
                pl.BlockSpec((1, TN), lambda i, j, k: (0, j)),
            ],
            out_specs=pl.BlockSpec((TM, TN), lambda i, j, k: (i, j)),
            scratch_shapes=[pltpu.VMEM((TM, TN), jnp.float32)],
        ),
        compiler_params=pltpu.CompilerParams(
            dimension_semantics=("parallel", "parallel", "arbitrary"),
            vmem_limit_bytes=_vmem_limit(blk_bytes, acc_bytes)),
    )(x2d, w_t, b_row)


def _linear_channels_first(x, weight, bias, *, use_bf16=False, tk_max=None):
    """x (B, K, T), weight (N, K), bias (N,) -> (B, N, T). No HBM transposes."""
    B, K, T = x.shape
    N = weight.shape[0]
    out_dtype = x.dtype
    isz = jnp.dtype(x.dtype).itemsize
    sub_align = {4: 8, 2: 16, 1: 32}.get(isz, 8)
    if tk_max is None:
        tk_max = 2048 if isz <= 2 else 1024

    TN, grid_n = _tile(N, 512, sub_align)
    TT, grid_t = _tile(T, 512, 128)          # lane-dense output stores
    if B * grid_n * grid_t == 1:
        # v7x: give the second TensorCore something to do.
        if TT >= 256:
            TT = _round_up(_cdiv(T, 2), 128)
            grid_t = _cdiv(T, TT)
        elif TN >= 2 * sub_align:
            TN = _round_up(_cdiv(N, 2), sub_align)
            grid_n = _cdiv(N, TN)

    b_col = bias.reshape(N, 1)
    cast_dtype = jnp.bfloat16 if use_bf16 else None
    nt_k = _cdiv(K, tk_max)

    if nt_k == 1:
        # Whole-K strip: weight block depends only on n; with n as the
        # outermost grid axis it is fetched once per n and stays resident
        # while b / t iterate.
        TK = K
        blk_bytes = (TK * TT + TN * TK + TN + TN * TT) * isz
        return pl.pallas_call(
            functools.partial(_cf_nok_kernel, cast_dtype=cast_dtype),
            out_shape=jax.ShapeDtypeStruct((B, N, T), out_dtype),
            grid_spec=pltpu.PrefetchScalarGridSpec(
                num_scalar_prefetch=0,
                grid=(grid_n, B, grid_t),
                in_specs=[
                    pl.BlockSpec((1, TK, TT), lambda n, b, t: (b, 0, t)),
                    pl.BlockSpec((TN, TK), lambda n, b, t: (n, 0)),
                    pl.BlockSpec((TN, 1), lambda n, b, t: (n, 0)),
                ],
                out_specs=pl.BlockSpec((1, TN, TT), lambda n, b, t: (b, n, t)),
            ),
            compiler_params=pltpu.CompilerParams(
                dimension_semantics=("parallel", "parallel", "parallel"),
                vmem_limit_bytes=_vmem_limit(blk_bytes)),
        )(x, weight, b_col)

    TK = _round_up(_cdiv(K, nt_k), 128)
    grid_k = _cdiv(K, TK)
    Kp = grid_k * TK
    if Kp != K:                              # only the K overhang must be zero
        x = jnp.pad(x, ((0, 0), (0, Kp - K), (0, 0)))
        weight = jnp.pad(weight, ((0, 0), (0, Kp - K)))
    blk_bytes = (TK * TT + TN * TK + TN + TN * TT) * isz
    acc_bytes = TN * TT * 4
    return pl.pallas_call(
        functools.partial(_cf_k_kernel, cast_dtype=cast_dtype),
        out_shape=jax.ShapeDtypeStruct((B, N, T), out_dtype),
        grid_spec=pltpu.PrefetchScalarGridSpec(
            num_scalar_prefetch=0,
            grid=(grid_n, B, grid_t, grid_k),
            in_specs=[
                pl.BlockSpec((1, TK, TT), lambda n, b, t, k: (b, k, t)),
                pl.BlockSpec((TN, TK), lambda n, b, t, k: (n, k)),
                pl.BlockSpec((TN, 1), lambda n, b, t, k: (n, 0)),
            ],
            out_specs=pl.BlockSpec((1, TN, TT), lambda n, b, t, k: (b, n, t)),
            scratch_shapes=[pltpu.VMEM((TN, TT), jnp.float32)],
        ),
        compiler_params=pltpu.CompilerParams(
            dimension_semantics=("parallel", "parallel", "parallel",
                                 "arbitrary"),
            vmem_limit_bytes=_vmem_limit(blk_bytes, acc_bytes)),
    )(x, weight, b_col)


@functools.partial(jax.jit, static_argnames=("time_dim", "use_bf16", "tk_max"))
def seq_linear(x, weight, bias, *, time_dim=2, use_bf16=False, tk_max=None):
    """Pallas equivalent of SeqLinear.forward.

    use_bf16=True casts tiles to bf16 inside the kernel (f32 accumulation);
    recommended on every TPU generation, including v5e.  Passing bf16 arrays
    from the caller additionally halves HBM traffic.
    """
    n_out = weight.shape[0]
    if time_dim == 2:
        batch, in_features, time = x.shape
        if time >= 128 and n_out >= 128:
            # Channels-first kernel: no swapaxes HBM round trips; T is the
            # lane dim and N (>=128) fills the MXU rows.
            return _linear_channels_first(x, weight, bias,
                                          use_bf16=use_bf16, tk_max=tk_max)
        # Short T or skinny N: the flattened path (lane-dense over
        # out_features, MXU rows filled by B*T) wins; pay the transposes.
        x = jnp.swapaxes(x, 1, 2)
        out2d = _linear_flat(x.reshape(batch * time, in_features),
                             weight, bias, use_bf16=use_bf16, tk_max=tk_max)
        return jnp.swapaxes(out2d.reshape(batch, time, n_out), 1, 2)
    batch, time, in_features = x.shape
    out2d = _linear_flat(x.reshape(batch * time, in_features),
                         weight, bias, use_bf16=use_bf16, tk_max=tk_max)
    return out2d.reshape(batch, time, n_out)


def init_seq_linear_params(key, in_features, out_features, dtype=jnp.float32):
    """Matches nn.Linear defaults: U(-1/sqrt(in), 1/sqrt(in))."""
    kw, kb = jax.random.split(key)
    bound = 1.0 / (in_features ** 0.5)
    weight = jax.random.uniform(kw, (out_features, in_features), dtype,
                                minval=-bound, maxval=bound)
    bias = jax.random.uniform(kb, (out_features,), dtype,
                              minval=-bound, maxval=bound)
    return weight, bias


if __name__ == "__main__":
    key = jax.random.PRNGKey(0)
    keys = jax.random.split(key, 8)

    # --- small shapes, flattened path -------------------------------------
    B, K, N, T = 2, 32, 48, 8
    w, b = init_seq_linear_params(keys[0], K, N)

    x_td2 = jax.random.normal(keys[1], (B, K, T), jnp.float32)
    out = seq_linear(x_td2, w, b, time_dim=2)
    jax.block_until_ready(out)
    ref = jnp.einsum("bct,oc->bot", x_td2, w) + b[None, :, None]
    assert out.shape == (B, N, T)
    assert jnp.allclose(out, ref, atol=1e-3, rtol=1e-3)

    x_td1 = jax.random.normal(keys[2], (B, T, K), jnp.float32)
    out = seq_linear(x_td1, w, b, time_dim=1)
    jax.block_until_ready(out)
    ref = jnp.einsum("btc,oc->bto", x_td1, w) + b[None, None, :]
    assert out.shape == (B, T, N)
    assert jnp.allclose(out, ref, atol=1e-3, rtol=1e-3)

    # --- channels-first (transpose-free) kernel: T >= 128, out_features >= 128
    B2, K2, N2, T2 = 2, 64, 128, 256
    w2, b2 = init_seq_linear_params(keys[3], K2, N2)
    x_cf = jax.random.normal(keys[4], (B2, K2, T2), jnp.float32)
    out = seq_linear(x_cf, w2, b2, time_dim=2)
    jax.block_until_ready(out)
    ref_cf = jnp.einsum("bct,oc->bot", x_cf, w2) + b2[None, :, None]
    assert out.shape == (B2, N2, T2)
    assert jnp.allclose(out, ref_cf, atol=1e-3, rtol=1e-3)

    # bf16 compute via in-kernel cast (recommended on all gens incl. v5e)
    out_bf = seq_linear(x_cf, w2, b2, time_dim=2, use_bf16=True)
    jax.block_until_ready(out_bf)
    assert jnp.allclose(out_bf, ref_cf, atol=5e-2, rtol=5e-2)

    # caller-side bf16 inputs (halves HBM traffic; 16-sublane alignment path)
    out_b16 = seq_linear(x_cf.astype(jnp.bfloat16), w2.astype(jnp.bfloat16),
                         b2.astype(jnp.bfloat16), time_dim=2)
    jax.block_until_ready(out_b16)
    assert out_b16.dtype == jnp.bfloat16
    assert jnp.allclose(out_b16.astype(jnp.float32), ref_cf,
                        atol=1e-1, rtol=5e-2)

    # --- force the K-split (accumulator) kernels with a small tk_max -------
    B3, K3, N3, T3 = 2, 256, 48, 8
    w3, b3 = init_seq_linear_params(keys[5], K3, N3)
    x3 = jax.random.normal(keys[6], (B3, K3, T3), jnp.float32)
    out = seq_linear(x3, w3, b3, time_dim=2, tk_max=128)       # flat, K grid
    jax.block_until_ready(out)
    ref3 = jnp.einsum("bct,oc->bot", x3, w3) + b3[None, :, None]
    assert jnp.allclose(out, ref3, atol=1e-3, rtol=1e-3)

    N4, T4 = 128, 128
    w4, b4 = init_seq_linear_params(keys[7], K3, N4)
    x4 = jax.random.normal(keys[6], (B3, K3, T4), jnp.float32)
    out = seq_linear(x4, w4, b4, time_dim=2, tk_max=128)       # CF, K grid
    jax.block_until_ready(out)
    ref4 = jnp.einsum("bct,oc->bot", x4, w4) + b4[None, :, None]
    assert jnp.allclose(out, ref4, atol=1e-3, rtol=1e-3)

    print("KERNEL_OK")
</pallas_src>

<mosaic_0001>
module attributes {stable_mosaic.version = 11 : i64} {
  func.func @_flat_nok_kernel(%arg0: i32, %arg1: i32, %arg2: memref<8x32xf32, #tpu.memory_space<vmem>>, %arg3: memref<32x128xf32, #tpu.memory_space<vmem>>, %arg4: memref<1x128xf32, #tpu.memory_space<vmem>>, %arg5: memref<8x128xf32, #tpu.memory_space<vmem>>) attributes {dimension_semantics = [#tpu.dimension_semantics<parallel>, #tpu.dimension_semantics<parallel>], iteration_bounds = array<i64: 2, 1>, scalar_prefetch = 0 : i64, scratch_operands = 0 : i64, tpu.core_type = #tpu.core_type<tc>, window_params = [{transform_indices = @transform_0, window_bounds = array<i64: 8, 32>}, {transform_indices = @transform_1, window_bounds = array<i64: 32, 128>}, {transform_indices = @transform_2, window_bounds = array<i64: 1, 128>}, {transform_indices = @transform_3, window_bounds = array<i64: 8, 128>}]} {
    %c0 = arith.constant 0 : index
    %c0_0 = arith.constant 0 : index
    %0 = vector.load %arg2[%c0, %c0_0] : memref<8x32xf32, #tpu.memory_space<vmem>>, vector<8x32xf32>
    %c0_1 = arith.constant 0 : index
    %c0_2 = arith.constant 0 : index
    %1 = vector.load %arg3[%c0_1, %c0_2] : memref<32x128xf32, #tpu.memory_space<vmem>>, vector<32x128xf32>
    %cst = arith.constant dense<0.000000e+00> : vector<8x128xf32>
    %2 = tpu.matmul %0, %1, %cst {dimension_numbers = #tpu.dot_dimension_numbers<[1], [0], [0], [1], [0, 0, 1, 1], [], []>} : vector<8x32xf32>, vector<32x128xf32>, vector<8x128xf32> -> vector<8x128xf32>
    %c0_3 = arith.constant 0 : index
    %c0_4 = arith.constant 0 : index
    %3 = vector.load %arg4[%c0_3, %c0_4] : memref<1x128xf32, #tpu.memory_space<vmem>>, vector<1x128xf32>
    %4 = vector.broadcast %3 : vector<1x128xf32> to vector<8x128xf32>
    %5 = arith.addf %2, %4 : vector<8x128xf32>
    %c0_5 = arith.constant 0 : index
    %c0_6 = arith.constant 0 : index
    %6 = vector.load %arg5[%c0_5, %c0_6] : memref<8x128xf32, #tpu.memory_space<vmem>>, vector<8x128xf32>
    tpu.vector_store %arg5[%c0_5, %c0_6], %5 {strides = array<i32>} : memref<8x128xf32, #tpu.memory_space<vmem>>, vector<8x128xf32>,
    return
  }
  func.func @transform_0(%arg0: i32, %arg1: i32) -> (i32, i32) {
    %c0_i32 = arith.constant 0 : i32
    %c0_i32_0 = arith.constant 0 : i32
    return %arg0, %c0_i32 : i32, i32
  }
  func.func @transform_1(%arg0: i32, %arg1: i32) -> (i32, i32) {
    %c0_i32 = arith.constant 0 : i32
    %c0_i32_0 = arith.constant 0 : i32
    return %c0_i32, %arg1 : i32, i32
  }
  func.func @transform_2(%arg0: i32, %arg1: i32) -> (i32, i32) {
    %c0_i32 = arith.constant 0 : i32
    %c0_i32_0 = arith.constant 0 : i32
    return %c0_i32, %arg1 : i32, i32
  }
  func.func @transform_3(%arg0: i32, %arg1: i32) -> (i32, i32) {
    %c0_i32 = arith.constant 0 : i32
    return %arg0, %arg1 : i32, i32
  }
}

</mosaic_0001>

<bundles_post_ra>
// kernel: seq_linear.1
= control target key start
LH: loop header
LB: loop body
LE: loop exit
PB: predicated region body
PF: predicated region fallthrough
CT: control target
= control target key end

     0   :  { %8 = vsyncpa [#allocation3], 0  ;;  %s950_s0 = inlined_call_operand.hbm [shape: f32[16,32], index: 0, kind: input, shape index: {}]   ;;  %s951_s1 = inlined_call_operand.hbm [shape: f32[32,48], index: 1, kind: input, shape index: {}]   ;;  %s952_s2 = inlined_call_operand.vmem [shape: f32[1,48], index: 2, kind: input, shape index: {}]   ;;  %s953_s3 = inlined_call_operand.hbm [shape: f32[16,48], index: 3, kind: output, shape index: {}]  }
   0x1   :  { %10 = vsyncpa [#allocation3 + $0x1], 0 }
   0x2   :  { %11 = vsyncpa [#allocation6], 0 }
   0x3   :  { %12 = vsyncpa [#allocation4], 0 }
   0x4   :  { %14 = vsyncpa [#allocation4 + $0x1], 0  ;;  %s733_s12 = smov 0   ;;  %s735_s13 = smov 0  }
   0x5   :  { %s737_s14 = smov 0   ;;  %s739_s15 = smov 0  }
   0x6   :  { %s741_s16 = smov 0   ;;  %s743_s17 = smov 0  }
   0x7 LB: > { %s441_s18 = sadd.s32 4294967295, %s703_s17   ;;  %s442_s19 = sadd.s32 4294967294, %s703_s17   ;;  %s703_s17 = sphi %s743_s17, %s20_s17   ;;  %s699_s16 = sphi %s741_s16, %s977_s16   ;;  %s695_s15 = sphi %s739_s15, %s976_s15   ;;  %s691_s14 = sphi %s737_s14, %s975_s14   ;;  %s687_s13 = sphi %s735_s13, %s974_s13   ;;  %s683_s12 = sphi %s733_s12, %s973_s12  }
   0x8   : > { %p52_p0 = scmp.ne.s32.totalorder %s687_s13, %s683_s12  ;;  %p767_p1 = scmp.eq.s32.totalorder %s441_s18, 0 }
   0x9   : > { %p771_p2 = scmp.eq.s32.totalorder %s441_s18, 1  ;;  %p136_p3 = scmp.eq.s32.totalorder %s442_s19, 1 }
   0xa   : > { %s958_s20 = scalar_select %p767_p1, 1, 0 }
   0xb   : > { %s959_s21 = scalar_select %p771_p2, 1, 0 }
   0xc   : > { %p777_p4 = por %p767_p1, %p52_p0  ;;  %p443_p5 = scmp.ge.s32.totalorder %s703_s17, 1 }
   0xd   : > { %p782_p6 = por %p136_p3, %p52_p0  ;;  %p143_p7 = scmp.lt.s32.totalorder %s703_s17, 3 }
   0xe   : > { %s960_s22 = scalar_select %p777_p4, 1, 0 }
   0xf   : > { %s961_s23 = scalar_select %p782_p6, 1, 0 }
  0x10   : > { %p787_p8 = pnand %p443_p5, %p143_p7  ;;  %s705_s25 = smov [#allocation5]  }
  0x11   : > { %s157_s26 = sshll.u32 %s705_s25, 4  ;;  %s32_s28 = sadd.s32 1, %s699_s16  ;;  %s158_s26 = int_to_ptr.vmem [resolvable:$true] %s157_s26 }
  0x12   : > { %s962_s24 = scalar_select %p787_p8, 1, 0 }
  0x13   : > { %p489_p9 = pneg %p787_p8  ;;  %s559_s4 = scalar_lea.hbm %s951_s1, 512 }
  0x14   : > { %p560_p12 = scmp.ne.s32.totalorder %s951_s1, %s559_s4  ;;  %p566_p5 = scmp.lt.u32.totalorder %s559_s4, %s951_s1 }
  0x15   : > { %p796_p11 = pnand %p489_p9, %p767_p1 }
  0x17   : > { %p561_p13 = pneg %p796_p11 }
  0x19   : > { %p562_p0 = pnand %p561_p13, %p560_p12 }
  0x1b   : > { %p563_p3 = pneg %p562_p0 }
  0x1d   : > { %p568_p7 = pnand %p566_p5, %p563_p3 }
  0x1f   : > { %571 = shalt.err (!%p568_p7)
}
  0x20   : > { %s572_s9 = scalar_lea.vmem %s158_s26, 512  ;;  %p580_p1 = scmp.lt.s32.totalorder %s158_s26, %s158_s26 }
  0x21   : > { %p573_p9 = scmp.ne.s32.totalorder %s158_s26, %s572_s9  ;;  %p581_p4 = scmp.lt.s32.totalorder %s572_s9, %s572_s9 }
  0x23   : > { %p575_p10 = pnand %p573_p9, %p561_p13  ;;  %p582_p8 = por %p581_p4, %p580_p1 }
  0x25   : > { %p576_p6 = pneg %p575_p10 }
  0x27   : > { %p583_p2 = pnand %p582_p8, %p576_p6 }
  0x29   : > { %586 = shalt.err (!%p583_p2)
}
  0x2a   : > { %s706_s10 = smov 128   ;;  %s707_s11 = smov 8  }
  0x2b   : > { %492 = dma.hbm_to_vmem [thread:$0]  (!%p796_p11), %s951_s1, 512, %s158_s26, [#allocation6], %s706_s10, %s706_s10, %s707_s11  }
  0x2c   : > { %p34_p1 = scmp.ge.s32.totalorder %s32_s28, 2  ;;  %s39_s25 = sadd.s32 1, %s691_s14 }
  0x2d   : > { %p46_p2 = scmp.ne.s32.totalorder %s691_s14, %s687_s13  ;;  %p47_p4 = scmp.eq.s32.totalorder %s703_s17, 0 }
  0x2e   : > { %s979_s28 = smov (%p34_p1, %s32_s28), 0  ;;  %p965_p8 = scmp.ne.s32.totalorder %s959_s21, 0 }
  0x2f   : > { %p823_p6 = por %p47_p4, %p46_p2  ;;  %s36_s27 = ssub.s32 %s699_s16, %s979_s28 }
  0x30   : > { %p829_p10 = por %p965_p8, %p46_p2  ;;  %p502_p12 = scmp.lt.s32.totalorder %s703_s17, 2 }
  0x31   : > { %p37_p11 = scmp.eq.s32.totalorder %s36_s27, 0  ;;  %s177_s26 = sand.u32 1, %s691_s14  }
  0x32   : > { %s447_s4 = sshll.u32 %s177_s26, 3  ;;  %s448_s6 = sshll.u32 %s699_s16, 7 }
  0x33   : > { %s838_s5 = scalar_select %p37_p11, %s691_s14, %s39_s25  }
  0x34   : > { %s844_s9 = scalar_lea.hbm %s950_s0, %s448_s6  ;;  %s181_s21 = scalar_lea.vmem [#allocation2], %s447_s4 }
  0x35   : > { %s188_s10 = sshll.u32 %s181_s21, 4  ;;  %p850_p13 = pnand %p502_p12, %p823_p6  ;;  %s846_s10 = int_to_ptr.vmem [resolvable:$true] %s188_s10 }
  0x36   : > { %s178_s18 = scalar_lea.sflag [#allocation3], %s177_s26  ;;  %s587_s19 = scalar_lea.hbm %s844_s9, 128 }
  0x37   : > { %p588_p0 = scmp.ne.s32.totalorder %s844_s9, %s587_s19  ;;  %p589_p3 = pneg %p850_p13 }
  0x38   : > { %s592_s4 = scalar_lea.hbm %s950_s0, 256  ;;  %p593_p9 = scmp.lt.u32.totalorder %s844_s9, %s950_s0 }
  0x39   : > { %p590_p5 = pnand %p589_p3, %p588_p0  ;;  %p594_p1 = scmp.lt.u32.totalorder %s592_s4, %s587_s19 }
  0x3a   : > { %p596_p4 = scmp.lt.u32.totalorder %s587_s19, %s844_s9 }
  0x3b   : > { %p591_p7 = pneg %p590_p5  ;;  %p595_p2 = por %p594_p1, %p593_p9 }
  0x3d   : > { %p597_p6 = por %p596_p4, %p595_p2 }
  0x3f   : > { %p598_p8 = pnand %p597_p6, %p591_p7 }
  0x41   : > { %601 = shalt.err (!%p598_p8)
}
  0x42   : > { %s602_s26 = scalar_lea.vmem %s846_s10, 128  ;;  %s708_s7 = smov [#allocation2]  }
  0x43   : > { %p603_p12 = scmp.ne.s32.totalorder %s846_s10, %s602_s26  ;;  %s607_s8 = sshll.u32 %s708_s7, 4  ;;  %s608_s8 = int_to_ptr.vmem [resolvable:$false] %s607_s8 }
  0x44   : > { %s609_s21 = scalar_lea.vmem %s608_s8, 256  ;;  %p610_p5 = scmp.lt.s32.totalorder %s846_s10, %s608_s8 }
  0x45   : > { %p605_p11 = pnand %p603_p12, %p589_p3  ;;  %p611_p9 = scmp.lt.s32.totalorder %s609_s21, %s602_s26 }
  0x47   : > { %p606_p0 = pneg %p605_p11  ;;  %p612_p1 = por %p611_p9, %p610_p5 }
  0x49   : > { %p613_p2 = pnand %p612_p1, %p606_p0 }
  0x4b   : > { %616 = shalt.err (!%p613_p2)
}
  0x4c   : > { %496 = dma.hbm_to_vmem [thread:$0]  (!%p850_p13), %s844_s9, 128, %s846_s10, %s178_s18  }
  0x4d   : > { %p968_p7 = scmp.ne.s32.totalorder %s962_s24, 0 }
  0x4e   : > { %s882_s19 = sand.u32 (!%p968_p7), 1, %s687_s13   ;;  %p969_p3 = scmp.ne.s32.totalorder (!%p968_p7), %s960_s22, 0 }
  0x4f   : > { %197 = sbr.rel (%p968_p7) target bundleno = 329 (0x149), region = 32  ;;  %s450_s25 = sshll.u32 (!%p968_p7), %s882_s19, 3 }
  0x50   : > { %s200_s27 = scalar_lea.sflag (!%p968_p7), [#allocation3], %s882_s19  ;;  %s203_s4 = scalar_lea.vmem (!%p968_p7), [#allocation2], %s450_s25 }
  0x56   : > { %670 = dma.done.wait (%p969_p3), %s200_s27, 128  }
  0x57   : > { %672 = vsyncadd (%p969_p3), %s200_s27, 4294967168  ;;  %p970_p4 = scmp.ne.s32.totalorder %s958_s20, 0 }
  0x59   : > { %674 = dma.done.wait (%p970_p4), [#allocation6], 512  }
  0x5a   : > { %676 = vsyncadd (%p970_p4), [#allocation6], 4294966784  ;;  %v709_v0 = vmov 0.0|0.0   ;;  %vm710_vm0 = vmmov 0   ;;  %v711_v1 = vmov 0.0   ;;  %v237_v2 = vld [vmem:[#allocation5] sm:$0xff] }
  0x5b   : > { %475 = vmatprep.subr.bf16.mxu0 %v709_v0  ;;  %472 = vmatprep.mubr.msk.f32.mxu0 %vm710_vm0, %v711_v1  ;;  %v238_v3 = vld [vmem:[#allocation5 + $0x8] sm:$0xff]  ;;  %v239_v4 = vld [vmem:[#allocation5 + $0x10] sm:$0xff]  ;;  %v240_v6 = vld [vmem:[#allocation5 + $0x18] sm:$0xff]  ;;  %vm248_vm1 = vcmask 261120   ;;  %s456_s24 = sshll.u32 %s695_s15, 7  ;;  %s232_s9 = scalar_lea.vmem [#allocation7], %s450_s25 }
  0x5c   : > { %v476_v5 = vpack.c.bf16 %v238_v3, %v237_v2  ;;  %v479_v7 = vpack.c.bf16 %v240_v6, %v239_v4  ;;  %v236_v8 = vld [vmem:[%s203_s4] sm:$0xff]  ;;  %s338_s10 = sshll.u32 %s232_s9, 4  ;;  %s901_s29 = scalar_lea.hbm %s953_s3, %s456_s24  ;;  %s903_s10 = int_to_ptr.vmem [resolvable:$true] %s338_s10 }
  0x5d   : > { %v453_v9 = vld [vmem:[%s952_s2] ss:$0 sm:$0xff]  ;;  %s324_s6 = scalar_lea.sflag [#allocation4], %s882_s19  ;;  %s617_s26 = scalar_lea.vmem %s903_s10, 128 }
  0x5e   : > { %477 = vmatpush3.bf16.msra.mxu0 %v476_v5  ;;  %p618_p13 = scmp.ne.s32.totalorder %s903_s10, %s617_s26  ;;  %s712_s15 = smov [#allocation7]  }
  0x5f   : > { %478 = vmatprep.subr.bf16.mxu0 %v709_v0  ;;  %s621_s7 = sshll.u32 %s712_s15, 4  ;;  %s622_s7 = int_to_ptr.vmem [resolvable:$false] %s621_s7 }
  0x60   : > { %p619_p6 = pnand %p618_p13, %p829_p10  ;;  %s623_s8 = scalar_lea.vmem %s622_s7, 256 }
  0x61   : > { %p624_p12 = scmp.lt.s32.totalorder %s903_s10, %s622_s7  ;;  %p625_p11 = scmp.lt.s32.totalorder %s623_s8, %s617_s26 }
  0x62   : > { %480 = vmatpush3.bf16.msra.mxu0 %v479_v7  ;;  %p620_p8 = pneg %p619_p6 }
  0x63   : > { %p626_p0 = por %p625_p11, %p624_p12 }
  0x65   : > { %473 = vmatmul.mubr.msk.f32.vlgmr.msra.gmra.mrb[0].mxu0 %vm248_vm1, %v236_v8  ;;  %p627_p5 = pnand %p626_p0, %p620_p8 }
 0x138   : > { %v318_v10 = vpop.f32.mrb[0].mxu0 }
 0x139   : > { %v319_v11 = vadd.f32 %v453_v9, %v318_v10  ;;  %v474_v12 = vpop.f32.mrb[1].mxu0 }
 0x13b   : > { %322 = vst [vmem:[%s232_s9] sm:$0xff] %v319_v11 }
 0x13c   : > { %630 = shalt.err (!%p627_p5)
}
 0x13d   : > { %s631_s21 = scalar_lea.hbm %s901_s29, 128  ;;  %s635_s27 = scalar_lea.hbm %s953_s3, 256 }
 0x13e   : > { %p632_p9 = scmp.ne.s32.totalorder %s901_s29, %s631_s21  ;;  %p636_p7 = scmp.lt.u32.totalorder %s901_s29, %s953_s3 }
 0x13f   : > { %p637_p3 = scmp.lt.u32.totalorder %s635_s27, %s631_s21  ;;  %p639_p13 = scmp.lt.u32.totalorder %s631_s21, %s901_s29 }
 0x140   : > { %p633_p1 = pnand %p632_p9, %p829_p10 }
 0x141   : > { %p638_p4 = por %p637_p3, %p636_p7 }
 0x142   : > { %p634_p2 = pneg %p633_p1 }
 0x143   : > { %p640_p6 = por %p639_p13, %p638_p4 }
 0x145   : > { %p641_p8 = pnand %p640_p6, %p634_p2 }
 0x147   : > { %644 = shalt.err (!%p641_p8)
}
 0x148   : > { %487 = dma.vmem_to_hbm [thread:$0]  (%p829_p10), %s903_s10, 128, %s901_s29, %s324_s6  }
 0x149 PF: > { %s350_s22 = sand.u32 1, %s683_s12   ;;  %p971_p12 = scmp.ne.s32.totalorder %s961_s23, 0 }
 0x14a   : > { %p972_p11 = scmp.ge.s32.totalorder %s703_s17, 2  ;;  %s351_s24 = scalar_lea.sflag [#allocation4], %s350_s22 }
 0x14c   : > { %p498_p0 = pnand %p972_p11, %p971_p12 }
 0x14e   : > { %678 = dma.done.wait (!%p498_p0), %s351_s24, 128  }
 0x14f   : > { %680 = vsyncadd (!%p498_p0), %s351_s24, 4294967168  ;;  %s20_s17 = sadd.s32 1, %s703_s17   ;;  %s973_s12 = smov %s687_s13 }
 0x150   : > { %p17_p5 = scmp.ge.s32.totalorder %s20_s17, 4   ;;  %s974_s13 = smov %s691_s14 }
 0x151   : > { %s975_s14 = smov %s838_s5  ;;  %s976_s15 = smov %s699_s16 }
 0x152   : > { %s977_s16 = smov %s979_s28  ;;  %19 = sbr.rel (!%p17_p5) target bundleno = 7 (0x7), region = 85 }
 0x159   :  { %356 = vsyncpa [#allocation3], 1 }
 0x15a   :  { %358 = vsyncpa [#allocation3 + $0x1], 1 }
 0x15b   :  { %359 = vsyncpa [#allocation6], 1 }
 0x15c   :  { %360 = vsyncpa [#allocation4], 1 }
 0x15d   :  { %362 = vsyncpa [#allocation4 + $0x1], 1 }

</bundles_post_ra>
